<compile_context>
chip_gen: v7x
topology: tpu7x:2x2x1
jax: 0.10.0
libtpu: 0.0.40
codegen_flags: <defaults>
</compile_context>

<pallas_src>
import functools
import math

import jax
import jax.numpy as jnp
from jax.experimental import pallas as pl
from jax.experimental.pallas import tpu as pltpu


def _local_mlp_kernel(x_ref, w1_ref, b1_ref, w2_ref, b2_ref, o_ref, h_ref,
                      *, scale1, scale2, neg_slope):
    # Compute the hidden layer once per batch tile (first output-tile step),
    # with the second equalized-lr scale pre-folded into the cached activations.
    @pl.when(pl.program_id(1) == 0)
    def _():
        xs = x_ref[...].astype(jnp.float32) * scale1          # scale activations, not W1
        h = jnp.dot(xs.astype(w1_ref.dtype), w1_ref[...],
                    preferred_element_type=jnp.float32) + b1_ref[...]
        h = jnp.where(h >= 0.0, h, neg_slope * h)              # LeakyReLU(0.01)
        h_ref[...] = h * scale2                                # fold scale2 once

    # Second EqualLinear on the current (H, tn) block of W2.
    y = jnp.dot(h_ref[...].astype(w2_ref.dtype), w2_ref[...],
                preferred_element_type=jnp.float32) + b2_ref[...]
    o_ref[...] = y.astype(o_ref.dtype)


def init_local_mlp_params(key, dim_component, dim_style, num_w_layers,
                          latent_squeeze_ratio=1, lr_mul=1.0,
                          dtype=jnp.float32):
    """EqualLinear init: weight ~ randn(out, in) / lr_mul, bias = 0."""
    hidden = dim_style // latent_squeeze_ratio
    out_dim = dim_style * num_w_layers
    k1, k2 = jax.random.split(key)
    w1 = jax.random.normal(k1, (hidden, dim_component), jnp.float32) / lr_mul
    w2 = jax.random.normal(k2, (out_dim, hidden), jnp.float32) / lr_mul
    b1 = jnp.zeros((1, hidden), jnp.float32)
    b2 = jnp.zeros((1, out_dim), jnp.float32)
    return dict(
        w1_t=jnp.asarray(w1.T, dtype),     # [C_in, hidden]   (bf16 OK on v6e/v7x)
        b1=(b1 * lr_mul).astype(jnp.float32),
        w2_t=jnp.asarray(w2.T, dtype),     # [hidden, out_dim]
        b2=(b2 * lr_mul).astype(jnp.float32),
        scale1=(1.0 / math.sqrt(dim_component)) * lr_mul,
        scale2=(1.0 / math.sqrt(hidden)) * lr_mul,
    )


def local_mlp_forward(x, params, *, num_w_layers, dim_style,
                      block_b=None, block_n=None):
    w1_t, b1 = params["w1_t"], params["b1"]
    w2_t, b2 = params["w2_t"], params["b2"]
    B, C = x.shape
    H = w1_t.shape[1]
    O = w2_t.shape[1]

    # Batch tile: fill the MXU M dimension when B allows (cap 256 for v6e/v7x;
    # still fine on v5e's 128x128 MXU), else take the full batch.
    if block_b is None:
        block_b = min(B, 256)
    # Output tile: stream W2 through the pipeline in lane-dense column blocks.
    if block_n is None:
        block_n = min(O, 1024)

    kernel = functools.partial(
        _local_mlp_kernel,
        scale1=float(params["scale1"]),
        scale2=float(params["scale2"]),
        neg_slope=0.01,
    )

    bytes_per = jnp.dtype(x.dtype).itemsize
    cost = pl.CostEstimate(
        flops=2 * B * (C * H + H * O),
        transcendentals=0,
        bytes_accessed=(B * C + B * O) * bytes_per
                       + (C * H + H * O) * jnp.dtype(w1_t.dtype).itemsize
                       + (H + O) * 4,
    )

    out_flat = pl.pallas_call(
        kernel,
        out_shape=jax.ShapeDtypeStruct((B, O), x.dtype),
        grid_spec=pltpu.PrefetchScalarGridSpec(
            num_scalar_prefetch=0,
            grid=(pl.cdiv(B, block_b), pl.cdiv(O, block_n)),
            in_specs=[
                pl.BlockSpec((block_b, C), lambda i, j: (i, 0)),   # x tile
                pl.BlockSpec((C, H), lambda i, j: (0, 0)),         # W1^T (resident, small)
                pl.BlockSpec((1, H), lambda i, j: (0, 0)),         # b1
                pl.BlockSpec((H, block_n), lambda i, j: (0, j)),   # W2^T column block (streamed)
                pl.BlockSpec((1, block_n), lambda i, j: (0, j)),   # b2 block
            ],
            out_specs=pl.BlockSpec((block_b, block_n), lambda i, j: (i, j)),
            scratch_shapes=[pltpu.VMEM((block_b, H), jnp.float32)],  # cached hidden acts
        ),
        compiler_params=pltpu.CompilerParams(
            dimension_semantics=("parallel", "arbitrary")),
        cost_estimate=cost,
    )(x, w1_t, b1, w2_t, b2)

    # Wrapper-side glue: flat lane-dense slab -> [B, num_w_layers, dim_style].
    return out_flat.reshape(B, num_w_layers, dim_style)


def _reference_forward(x, p, num_w_layers, dim_style):
    # Mirrors PyTorch EqualLinear: scale folded into the weights.
    w1 = p["w1_t"].astype(jnp.float32) * p["scale1"]
    w2 = p["w2_t"].astype(jnp.float32) * p["scale2"]
    h = x @ w1 + p["b1"]
    h = jnp.where(h >= 0.0, h, 0.01 * h)
    y = h @ w2 + p["b2"]
    return y.reshape(-1, num_w_layers, dim_style)


if __name__ == "__main__":
    # Small shapes consistent with the module (defaults are 512/512/18).
    bs = 8
    dim_component = 128
    dim_style = 128
    num_w_layers = 4
    latent_squeeze_ratio = 1

    key = jax.random.PRNGKey(0)
    k_params, k_x = jax.random.split(key)

    params = init_local_mlp_params(
        k_params, dim_component, dim_style, num_w_layers,
        latent_squeeze_ratio=latent_squeeze_ratio, lr_mul=1.0)

    x = jax.random.normal(k_x, (bs, dim_component), jnp.float32)

    out = local_mlp_forward(x, params,
                            num_w_layers=num_w_layers, dim_style=dim_style)
    out = jax.block_until_ready(out)

    assert out.shape == (bs, num_w_layers, dim_style), out.shape

    ref = _reference_forward(x, params, num_w_layers, dim_style)
    assert jnp.allclose(out, ref, rtol=1e-4, atol=1e-4), \
        float(jnp.max(jnp.abs(out - ref)))

    print("KERNEL_OK")
</pallas_src>

<mosaic_0001>
module attributes {stable_mosaic.version = 11 : i64} {
  func.func @_local_mlp_kernel(%arg0: i32, %arg1: i32, %arg2: memref<8x128xf32, #tpu.memory_space<vmem>>, %arg3: memref<128x128xf32, #tpu.memory_space<vmem>>, %arg4: memref<1x128xf32, #tpu.memory_space<vmem>>, %arg5: memref<128x512xf32, #tpu.memory_space<vmem>>, %arg6: memref<1x512xf32, #tpu.memory_space<vmem>>, %arg7: memref<8x512xf32, #tpu.memory_space<vmem>>, %arg8: memref<8x128xf32, #tpu.memory_space<vmem>>) attributes {dimension_semantics = [#tpu.dimension_semantics<parallel>, #tpu.dimension_semantics<arbitrary>], iteration_bounds = array<i64: 1, 1>, scalar_prefetch = 0 : i64, scratch_operands = 1 : i64, tpu.core_type = #tpu.core_type<tc>, window_params = [{transform_indices = @transform_0, window_bounds = array<i64: 8, 128>}, {pipeline_mode = #tpu.pipeline_mode<synchronous>, transform_indices = @transform_1, window_bounds = array<i64: 128, 128>}, {pipeline_mode = #tpu.pipeline_mode<synchronous>, transform_indices = @transform_2, window_bounds = array<i64: 1, 128>}, {transform_indices = @transform_3, window_bounds = array<i64: 128, 512>}, {transform_indices = @transform_4, window_bounds = array<i64: 1, 512>}, {transform_indices = @transform_5, window_bounds = array<i64: 8, 512>}]} {
    %c0_i32 = arith.constant 0 : i32
    %0 = arith.cmpi eq, %arg1, %c0_i32 : i32
    %1 = arith.extui %0 : i1 to i32
    %c0_i32_0 = arith.constant 0 : i32
    %2 = arith.cmpi ne, %1, %c0_i32_0 : i32
    scf.if %2 {
      %c0_8 = arith.constant 0 : index
      %c0_9 = arith.constant 0 : index
      %10 = vector.load %arg2[%c0_8, %c0_9] : memref<8x128xf32, #tpu.memory_space<vmem>>, vector<8x128xf32>
      %cst_10 = arith.constant 0.0883883461 : f32
      %11 = vector.broadcast %cst_10 : f32 to vector<8x128xf32>
      %12 = arith.mulf %10, %11 : vector<8x128xf32>
      %c0_11 = arith.constant 0 : index
      %c0_12 = arith.constant 0 : index
      %13 = vector.load %arg3[%c0_11, %c0_12] : memref<128x128xf32, #tpu.memory_space<vmem>>, vector<128x128xf32>
      %cst_13 = arith.constant dense<0.000000e+00> : vector<8x128xf32>
      %14 = tpu.matmul %12, %13, %cst_13 {dimension_numbers = #tpu.dot_dimension_numbers<[1], [0], [0], [1], [0, 0, 1, 1], [], []>} : vector<8x128xf32>, vector<128x128xf32>, vector<8x128xf32> -> vector<8x128xf32>
      %c0_14 = arith.constant 0 : index
      %c0_15 = arith.constant 0 : index
      %15 = vector.load %arg4[%c0_14, %c0_15] : memref<1x128xf32, #tpu.memory_space<vmem>>, vector<1x128xf32>
      %16 = vector.broadcast %15 : vector<1x128xf32> to vector<8x128xf32>
      %17 = arith.addf %14, %16 : vector<8x128xf32>
      %cst_16 = arith.constant 0.000000e+00 : f32
      %18 = vector.broadcast %cst_16 : f32 to vector<8x128xf32>
      %19 = arith.cmpf oge, %17, %18 : vector<8x128xf32>
      %cst_17 = arith.constant 0.00999999977 : f32
      %20 = vector.broadcast %cst_17 : f32 to vector<8x128xf32>
      %21 = arith.mulf %20, %17 : vector<8x128xf32>
      %22 = arith.select %19, %17, %21 : vector<8x128xi1>, vector<8x128xf32>
      %cst_18 = arith.constant 0.0883883461 : f32
      %23 = vector.broadcast %cst_18 : f32 to vector<8x128xf32>
      %24 = arith.mulf %22, %23 : vector<8x128xf32>
      %c0_19 = arith.constant 0 : index
      %c0_20 = arith.constant 0 : index
      %25 = vector.load %arg8[%c0_19, %c0_20] : memref<8x128xf32, #tpu.memory_space<vmem>>, vector<8x128xf32>
      tpu.vector_store %arg8[%c0_19, %c0_20], %24 {strides = array<i32>} : memref<8x128xf32, #tpu.memory_space<vmem>>, vector<8x128xf32>,
    } else {
    }
    %c0 = arith.constant 0 : index
    %c0_1 = arith.constant 0 : index
    %3 = vector.load %arg8[%c0, %c0_1] : memref<8x128xf32, #tpu.memory_space<vmem>>, vector<8x128xf32>
    %c0_2 = arith.constant 0 : index
    %c0_3 = arith.constant 0 : index
    %4 = vector.load %arg5[%c0_2, %c0_3] : memref<128x512xf32, #tpu.memory_space<vmem>>, vector<128x512xf32>
    %cst = arith.constant dense<0.000000e+00> : vector<8x512xf32>
    %5 = tpu.matmul %3, %4, %cst {dimension_numbers = #tpu.dot_dimension_numbers<[1], [0], [0], [1], [0, 0, 1, 1], [], []>} : vector<8x128xf32>, vector<128x512xf32>, vector<8x512xf32> -> vector<8x512xf32>
    %c0_4 = arith.constant 0 : index
    %c0_5 = arith.constant 0 : index
    %6 = vector.load %arg6[%c0_4, %c0_5] : memref<1x512xf32, #tpu.memory_space<vmem>>, vector<1x512xf32>
    %7 = vector.broadcast %6 : vector<1x512xf32> to vector<8x512xf32>
    %8 = arith.addf %5, %7 : vector<8x512xf32>
    %c0_6 = arith.constant 0 : index
    %c0_7 = arith.constant 0 : index
    %9 = vector.load %arg7[%c0_6, %c0_7] : memref<8x512xf32, #tpu.memory_space<vmem>>, vector<8x512xf32>
    tpu.vector_store %arg7[%c0_6, %c0_7], %8 {strides = array<i32>} : memref<8x512xf32, #tpu.memory_space<vmem>>, vector<8x512xf32>,
    return
  }
  func.func @transform_0(%arg0: i32, %arg1: i32) -> (i32, i32) {
    %c0_i32 = arith.constant 0 : i32
    %c0_i32_0 = arith.constant 0 : i32
    return %arg0, %c0_i32 : i32, i32
  }
  func.func @transform_1(%arg0: i32, %arg1: i32) -> (i32, i32) {
    %c0_i32 = arith.constant 0 : i32
    %c0_i32_0 = arith.constant 0 : i32
    %c0_i32_1 = arith.constant 0 : i32
    return %c0_i32, %c0_i32_0 : i32, i32
  }
  func.func @transform_2(%arg0: i32, %arg1: i32) -> (i32, i32) {
    %c0_i32 = arith.constant 0 : i32
    %c0_i32_0 = arith.constant 0 : i32
    %c0_i32_1 = arith.constant 0 : i32
    return %c0_i32, %c0_i32_0 : i32, i32
  }
  func.func @transform_3(%arg0: i32, %arg1: i32) -> (i32, i32) {
    %c0_i32 = arith.constant 0 : i32
    %c0_i32_0 = arith.constant 0 : i32
    return %c0_i32, %arg1 : i32, i32
  }
  func.func @transform_4(%arg0: i32, %arg1: i32) -> (i32, i32) {
    %c0_i32 = arith.constant 0 : i32
    %c0_i32_0 = arith.constant 0 : i32
    return %c0_i32, %arg1 : i32, i32
  }
  func.func @transform_5(%arg0: i32, %arg1: i32) -> (i32, i32) {
    %c0_i32 = arith.constant 0 : i32
    return %arg0, %arg1 : i32, i32
  }
}

</mosaic_0001>

<bundles_post_ra>
// kernel: tpu_custom_call.1
= control target key start
LH: loop header
LB: loop body
LE: loop exit
PB: predicated region body
PF: predicated region fallthrough
CT: control target
= control target key end

     0   :  { %10 = vsyncpa [#allocation4], 0  ;;  %s765_s0 = inlined_call_operand.hbm [shape: f32[8,128], index: 0, kind: input, shape index: {}]   ;;  %s766_s1 = inlined_call_operand.hbm [shape: f32[128,128], index: 1, kind: input, shape index: {}]   ;;  %s767_s2 = inlined_call_operand.vmem [shape: f32[1,128], index: 2, kind: input, shape index: {}]   ;;  %s768_s3 = inlined_call_operand.hbm [shape: f32[128,512], index: 3, kind: input, shape index: {}]   ;;  %s769_s4 = inlined_call_operand.vmem [shape: f32[1,512], index: 4, kind: input, shape index: {}]   ;;  %s770_s5 = inlined_call_operand.hbm [shape: f32[8,512], index: 5, kind: output, shape index: {}]  }
   0x1   :  { %11 = vsyncpa [#allocation7], 0 }
   0x2   :  { %12 = vsyncpa [#allocation5], 0  ;;  %s659_s18 = smov [#allocation6]   ;;  %s565_s22 = scalar_lea.hbm %s766_s1, 2048 }
   0x3   :  { %s28_s19 = sshll.u32 %s659_s18, 4  ;;  %p566_p0 = scmp.ne.s32.totalorder %s766_s1, %s565_s22  ;;  %s29_s19 = int_to_ptr.vmem [resolvable:$true] %s28_s19 }
   0x4   :  { %p569_p1 = scmp.lt.u32.totalorder %s565_s22, %s766_s1 }
   0x6   :  { %p571_p2 = pnand %p569_p1, %p566_p0 }
   0x8   :  { %574 = shalt.err (!%p571_p2)
}
   0x9   :  { %s575_s27 = scalar_lea.vmem %s29_s19, 2048  ;;  %p580_p4 = scmp.lt.s32.totalorder %s29_s19, %s29_s19 }
   0xa   :  { %p576_p3 = scmp.ne.s32.totalorder %s29_s19, %s575_s27  ;;  %p581_p5 = scmp.lt.s32.totalorder %s575_s27, %s575_s27 }
   0xc   :  { %p582_p6 = por %p581_p5, %p580_p4 }
   0xe   :  { %p583_p7 = pnand %p582_p6, %p576_p3 }
  0x10   :  { %586 = shalt.err (!%p583_p7)
}
  0x11   :  { %s660_s28 = smov 128   ;;  %s661_s29 = smov 8  }
  0x12   :  { %34 = dma.hbm_to_vmem [thread:$0]  %s766_s1, 2048, %s29_s19, [#allocation7], %s660_s28, %s660_s28, %s661_s29  }
  0x13   :  { %s662_s7 = smov [#allocation3]   ;;  %s663_s9 = smov [#allocation8]  }
  0x14   :  { %s19_s8 = sshll.u32 %s662_s7, 4  ;;  %s42_s10 = sshll.u32 %s663_s9, 4  ;;  %s20_s8 = int_to_ptr.vmem [resolvable:$true] %s19_s8  ;;  %s43_s10 = int_to_ptr.vmem [resolvable:$true] %s42_s10 }
  0x15   :  { %s587_s13 = scalar_lea.hbm %s765_s0, 128 }
  0x16   :  { %p588_p8 = scmp.ne.s32.totalorder %s765_s0, %s587_s13  ;;  %p591_p9 = scmp.lt.u32.totalorder %s587_s13, %s765_s0 }
  0x18   :  { %p593_p10 = pnand %p591_p9, %p588_p8 }
  0x1a   :  { %596 = shalt.err (!%p593_p10)
}
  0x1b   :  { %s597_s1 = scalar_lea.vmem %s20_s8, 128  ;;  %p602_p12 = scmp.lt.s32.totalorder %s20_s8, %s20_s8 }
  0x1c   :  { %p598_p11 = scmp.ne.s32.totalorder %s20_s8, %s597_s1  ;;  %p603_p13 = scmp.lt.s32.totalorder %s597_s1, %s597_s1 }
  0x1e   :  { %p604_p0 = por %p603_p13, %p602_p12 }
  0x20   :  { %p605_p1 = pnand %p604_p0, %p598_p11 }
  0x22   :  { %608 = shalt.err (!%p605_p1)
}
  0x23   :  { %22 = dma.hbm_to_vmem [thread:$0]  %s765_s0, 128, %s20_s8, [#allocation4]  }
  0x24   :  { %s609_s22 = scalar_lea.hbm %s768_s3, 8192 }
  0x25   :  { %p610_p2 = scmp.ne.s32.totalorder %s768_s3, %s609_s22  ;;  %p613_p3 = scmp.lt.u32.totalorder %s609_s22, %s768_s3 }
  0x27   :  { %p615_p4 = pnand %p613_p3, %p610_p2 }
  0x29   :  { %618 = shalt.err (!%p615_p4)
}
  0x2a   :  { %s619_s27 = scalar_lea.vmem %s43_s10, 8192  ;;  %p624_p6 = scmp.lt.s32.totalorder %s43_s10, %s43_s10 }
  0x2b   :  { %p620_p5 = scmp.ne.s32.totalorder %s43_s10, %s619_s27  ;;  %p625_p7 = scmp.lt.s32.totalorder %s619_s27, %s619_s27 }
  0x2d   :  { %p626_p8 = por %p625_p7, %p624_p6 }
  0x2f   :  { %p627_p9 = pnand %p626_p8, %p620_p5 }
  0x31   :  { %630 = shalt.err (!%p627_p9)
}
  0x32   :  { %s664_s0 = smov 512   ;;  %s665_s28 = smov 32  }
  0x33   :  { %48 = dma.hbm_to_vmem [thread:$0]  %s768_s3, 8192, %s43_s10, [#allocation7], %s664_s0, %s664_s0, %s665_s28  }
  0x34   :  { %653 = dma.done.wait [#allocation4], 128  }
  0x35   :  { %654 = vsyncadd [#allocation4], 4294967168 }
  0x36   :  { %655 = dma.done.wait [#allocation7], 10240  }
  0x37   :  { %656 = vsyncadd [#allocation7], 4294957056  ;;  %v666_v0 = vmov 0.0|0.0   ;;  %vm667_vm0 = vmmov 0   ;;  %v668_v1 = vmov 0.0   ;;  %v66_v2 = vld [vmem:[#allocation6] sm:$0xff] }
  0x38   :  { %466 = vmatprep.subr.bf16.mxu0 %v666_v0  ;;  %463 = vmatprep.mubr.msk.f32.mxu0 %vm667_vm0, %v668_v1  ;;  %v67_v3 = vld [vmem:[#allocation6 + $0x8] sm:$0xff]  ;;  %v68_v4 = vld [vmem:[#allocation6 + $0x10] sm:$0xff]  ;;  %v69_v6 = vld [vmem:[#allocation6 + $0x18] sm:$0xff] }
  0x39   :  { %315 = vmatprep.mubr.f32.mxu1 %v668_v1  ;;  %v467_v5 = vpack.c.bf16 %v67_v3, %v66_v2  ;;  %v470_v7 = vpack.c.bf16 %v69_v6, %v68_v4  ;;  %v70_v8 = vld [vmem:[#allocation6 + $0x20] sm:$0xff]  ;;  %v71_v9 = vld [vmem:[#allocation6 + $0x28] sm:$0xff]  ;;  %v72_v13 = vld [vmem:[#allocation6 + $0x30] sm:$0xff] }
  0x3a   :  { %v166_v10 = vld [vmem:[#allocation8 + $0x8] sm:$0xff]  ;;  %v473_v12 = vpack.c.bf16 %v71_v9, %v70_v8  ;;  %v165_v15 = vld [vmem:[#allocation8] sm:$0xff]  ;;  %v73_v17 = vld [vmem:[#allocation6 + $0x38] sm:$0xff] }
  0x3b   :  { %468 = vmatpush3.bf16.msra.mxu0 %v467_v5  ;;  %v170_v11 = vld [vmem:[#allocation8 + $0x28] sm:$0xff]  ;;  %v169_v16 = vld [vmem:[#allocation8 + $0x20] sm:$0xff]  ;;  %v476_v24 = vpack.c.bf16 %v73_v17, %v72_v13  ;;  %v76_v37 = vld [vmem:[#allocation6 + $0x50] sm:$0xff] }
  0x3c   :  { %469 = vmatprep.subr.bf16.mxu0 %v666_v0  ;;  %v490_v14 = vpack.c.bf16 %v170_v11, %v166_v10  ;;  %v492_v18 = vpack.c.bf16 %v169_v16, %v165_v15  ;;  %v174_v19 = vld [vmem:[#allocation8 + $0x48] sm:$0xff]  ;;  %v173_v22 = vld [vmem:[#allocation8 + $0x40] sm:$0xff]  ;;  %v77_v41 = vld [vmem:[#allocation6 + $0x58] sm:$0xff] }
  0x3d   :  { %v178_v20 = vld [vmem:[#allocation8 + $0x68] sm:$0xff]  ;;  %v177_v23 = vld [vmem:[#allocation8 + $0x60] sm:$0xff]  ;;  %v482_v45 = vpack.c.bf16 %v77_v41, %v76_v37  ;;  %v80_v58 = vld [vmem:[#allocation6 + $0x70] sm:$0xff] }
  0x3e   :  { %491 = vmatprep.subr.bf16.mxu1 %v490_v14  ;;  %v494_v21 = vpack.c.bf16 %v178_v20, %v174_v19  ;;  %v74_v25 = vld [vmem:[#allocation6 + $0x40] sm:$0xff]  ;;  %v496_v26 = vpack.c.bf16 %v177_v23, %v173_v22  ;;  %v182_v27 = vld [vmem:[#allocation8 + $0x88] sm:$0xff]  ;;  %v81_v59 = vld [vmem:[#allocation6 + $0x78] sm:$0xff] }
  0x3f   :  { %471 = vmatpush3.bf16.msra.mxu0 %v470_v7  ;;  %493 = vmatpush1.bf16.msra.mxu1 %v492_v18  ;;  %v186_v28 = vld [vmem:[#allocation8 + $0xa8] sm:$0xff]  ;;  %v181_v31 = vld [vmem:[#allocation8 + $0x80] sm:$0xff]  ;;  %v168_v60 = vld [vmem:[#allocation8 + $0x18] sm:$0xff]  ;;  %v488_v63 = vpack.c.bf16 %v81_v59, %v80_v58 }
  0x40   :  { %472 = vmatprep.subr.bf16.mxu0 %v666_v0  ;;  %495 = vmatprep.subr.bf16.mxu1 %v494_v21  ;;  %v75_v29 = vld [vmem:[#allocation6 + $0x48] sm:$0xff]  ;;  %v498_v30 = vpack.c.bf16 %v186_v28, %v182_v27  ;;  %v185_v32 = vld [vmem:[#allocation8 + $0xa0] sm:$0xff]  ;;  %v172_v61 = vld [vmem:[#allocation8 + $0x38] sm:$0xff] }
  0x41   :  { %v190_v33 = vld [vmem:[#allocation8 + $0xc8] sm:$0xff]  ;;  %v500_v34 = vpack.c.bf16 %v185_v32, %v181_v31  ;;  %v479_v36 = vpack.c.bf16 %v75_v29, %v74_v25  ;;  %v189_v39 = vld [vmem:[#allocation8 + $0xc0] sm:$0xff]  ;;  %v64_v2 = vld [vmem:[#allocation3] sm:$0xff]  ;;  %v522_v3 = vpack.c.bf16 %v172_v61, %v168_v60 }
  0x42   :  { %v194_v35 = vld [vmem:[#allocation8 + $0xe8] sm:$0xff]  ;;  %v193_v40 = vld [vmem:[#allocation8 + $0xe0] sm:$0xff]  ;;  %v167_v4 = vld [vmem:[#allocation8 + $0x10] sm:$0xff]  ;;  %v65_v8 = vmul.f32 0.088388346, %v64_v2 }
  0x43   :  { %474 = vmatpush3.bf16.msra.mxu0 %v473_v12  ;;  %497 = vmatpush1.bf16.msra.mxu1 %v496_v26  ;;  %v502_v38 = vpack.c.bf16 %v194_v35, %v190_v33  ;;  %v198_v42 = vld [vmem:[#allocation8 + $0x108] sm:$0xff]  ;;  %v504_v44 = vpack.c.bf16 %v193_v40, %v189_v39  ;;  %v78_v46 = vld [vmem:[#allocation6 + $0x60] sm:$0xff]  ;;  %v171_v5 = vld [vmem:[#allocation8 + $0x30] sm:$0xff] }
  0x44   :  { %475 = vmatprep.subr.bf16.mxu0 %v666_v0  ;;  %499 = vmatprep.subr.bf16.mxu1 %v498_v30  ;;  %v202_v43 = vld [vmem:[#allocation8 + $0x128] sm:$0xff]  ;;  %v197_v48 = vld [vmem:[#allocation8 + $0x100] sm:$0xff]  ;;  %v176_v6 = vld [vmem:[#allocation8 + $0x58] sm:$0xff]  ;;  %v524_v9 = vpack.c.bf16 %v171_v5, %v167_v4  ;;  %v231_v5 = vlaneseq }
  0x45   :  { %v506_v47 = vpack.c.bf16 %v202_v43, %v198_v42  ;;  %v201_v49 = vld [vmem:[#allocation8 + $0x120] sm:$0xff]  ;;  %v79_v50 = vld [vmem:[#allocation6 + $0x68] sm:$0xff]  ;;  %v180_v7 = vld [vmem:[#allocation8 + $0x78] sm:$0xff] }
  0x46   :  { %v206_v51 = vld [vmem:[#allocation8 + $0x148] sm:$0xff]  ;;  %v508_v53 = vpack.c.bf16 %v201_v49, %v197_v48  ;;  %v485_v54 = vpack.c.bf16 %v79_v50, %v78_v46  ;;  %v205_v56 = vld [vmem:[#allocation8 + $0x140] sm:$0xff]  ;;  %v526_v10 = vpack.c.bf16 %v180_v7, %v176_v6  ;;  %v175_v11 = vld [vmem:[#allocation8 + $0x50] sm:$0xff]  ;;  %v232_v6 = vshrl.u32 %v231_v5, 7 }
  0x47   :  { %477 = vmatpush3.bf16.msra.mxu0 %v476_v24  ;;  %501 = vmatpush1.bf16.msra.mxu1 %v500_v34  ;;  %v210_v52 = vld [vmem:[#allocation8 + $0x168] sm:$0xff]  ;;  %v209_v57 = vld [vmem:[#allocation8 + $0x160] sm:$0xff]  ;;  %v179_v12 = vld [vmem:[#allocation8 + $0x70] sm:$0xff] }
  0x48   :  { %478 = vmatprep.subr.bf16.mxu0 %v666_v0  ;;  %503 = vmatprep.subr.bf16.mxu1 %v502_v38  ;;  %v510_v55 = vpack.c.bf16 %v210_v52, %v206_v51  ;;  %v512_v62 = vpack.c.bf16 %v209_v57, %v205_v56  ;;  %v184_v13 = vld [vmem:[#allocation8 + $0x98] sm:$0xff]  ;;  %v528_v15 = vpack.c.bf16 %v179_v12, %v175_v11  ;;  %v183_v16 = vld [vmem:[#allocation8 + $0x90] sm:$0xff]  ;;  %v218_v37 = vld [vmem:[#allocation8 + $0x1a8] sm:$0xff]  ;;  %v233_v7 = vsub.s32 0, %v232_v6 }
  0x49   :  { %v188_v14 = vld [vmem:[#allocation8 + $0xb8] sm:$0xff]  ;;  %v187_v17 = vld [vmem:[#allocation8 + $0xb0] sm:$0xff]  ;;  %v213_v41 = vld [vmem:[#allocation8 + $0x180] sm:$0xff]  ;;  %v245_v11 = vsub.s32 3, %v232_v6 }
  0x4a   :  { %v192_v18 = vld [vmem:[#allocation8 + $0xd8] sm:$0xff]  ;;  %v532_v20 = vpack.c.bf16 %v187_v17, %v183_v16  ;;  %v191_v22 = vld [vmem:[#allocation8 + $0xd0] sm:$0xff]  ;;  %v217_v42 = vld [vmem:[#allocation8 + $0x1a0] sm:$0xff] }
  0x4b   :  { %480 = vmatpush3.bf16.msra.mxu0 %v479_v36  ;;  %505 = vmatpush1.bf16.msra.mxu1 %v504_v44  ;;  %v196_v19 = vld [vmem:[#allocation8 + $0xf8] sm:$0xff]  ;;  %v195_v23 = vld [vmem:[#allocation8 + $0xf0] sm:$0xff]  ;;  %v214_v36 = vld [vmem:[#allocation8 + $0x188] sm:$0xff]  ;;  %v516_v44 = vpack.c.bf16 %v217_v42, %v213_v41 }
  0x4c   :  { %481 = vmatprep.subr.bf16.mxu0 %v666_v0  ;;  %507 = vmatprep.subr.bf16.mxu1 %v506_v47  ;;  %v534_v21 = vpack.c.bf16 %v196_v19, %v192_v18  ;;  %v200_v24 = vld [vmem:[#allocation8 + $0x118] sm:$0xff]  ;;  %v536_v26 = vpack.c.bf16 %v195_v23, %v191_v22  ;;  %v199_v28 = vld [vmem:[#allocation8 + $0x110] sm:$0xff]  ;;  %v514_v39 = vpack.c.bf16 %v218_v37, %v214_v36  ;;  %v222_v48 = vld [vmem:[#allocation8 + $0x1c8] sm:$0xff] }
  0x4d   :  { %v204_v25 = vld [vmem:[#allocation8 + $0x138] sm:$0xff]  ;;  %v207_v33 = vld [vmem:[#allocation8 + $0x150] sm:$0xff]  ;;  %v226_v49 = vld [vmem:[#allocation8 + $0x1e8] sm:$0xff] }
  0x4e   :  { %v538_v27 = vpack.c.bf16 %v204_v25, %v200_v24  ;;  %v208_v29 = vld [vmem:[#allocation8 + $0x158] sm:$0xff]  ;;  %v211_v34 = vld [vmem:[#allocation8 + $0x170] sm:$0xff]  ;;  %v518_v51 = vpack.c.bf16 %v226_v49, %v222_v48 }
  0x4f   :  { %483 = vmatpush3.bf16.msra.mxu0 %v482_v45  ;;  %509 = vmatpush1.bf16.msra.mxu1 %v508_v53  ;;  %v212_v30 = vld [vmem:[#allocation8 + $0x178] sm:$0xff]  ;;  %v544_v35 = vpack.c.bf16 %v211_v34, %v207_v33  ;;  %v215_v45 = vld [vmem:[#allocation8 + $0x190] sm:$0xff]  ;;  %v221_v53 = vld [vmem:[#allocation8 + $0x1c0] sm:$0xff] }
  0x50   :  { %484 = vmatprep.subr.bf16.mxu0 %v666_v0  ;;  %511 = vmatprep.subr.bf16.mxu1 %v510_v55  ;;  %v542_v32 = vpack.c.bf16 %v212_v30, %v208_v29  ;;  %v216_v38 = vld [vmem:[#allocation8 + $0x198] sm:$0xff]  ;;  %v219_v46 = vld [vmem:[#allocation8 + $0x1b0] sm:$0xff] }
  0x51   :  { %v220_v40 = vld [vmem:[#allocation8 + $0x1b8] sm:$0xff]  ;;  %v548_v47 = vpack.c.bf16 %v219_v46, %v215_v45  ;;  %v223_v57 = vld [vmem:[#allocation8 + $0x1d0] sm:$0xff] }
  0x52   :  { %v546_v43 = vpack.c.bf16 %v220_v40, %v216_v38  ;;  %v224_v50 = vld [vmem:[#allocation8 + $0x1d8] sm:$0xff]  ;;  %v227_v58 = vld [vmem:[#allocation8 + $0x1f0] sm:$0xff] }
  0x53   :  { %486 = vmatpush3.bf16.msra.mxu0 %v485_v54  ;;  %513 = vmatpush1.bf16.msra.mxu1 %v512_v62  ;;  %v228_v52 = vld [vmem:[#allocation8 + $0x1f8] sm:$0xff]  ;;  %v225_v54 = vld [vmem:[#allocation8 + $0x1e0] sm:$0xff]  ;;  %v552_v59 = vpack.c.bf16 %v227_v58, %v223_v57 }
  0x54   :  { %487 = vmatprep.subr.bf16.mxu0 %v666_v0  ;;  %v530_v0 = vpack.c.bf16 %v188_v14, %v184_v13  ;;  %515 = vmatprep.subr.bf16.mxu1 %v514_v39  ;;  %v550_v55 = vpack.c.bf16 %v228_v52, %v224_v50  ;;  %v520_v56 = vpack.c.bf16 %v225_v54, %v221_v53  ;;  %v413_v60 = vld [vmem:[%s767_s2] ss:$0 sm:$0xff]  ;;  %s669_s2 = smov [#allocation9]  }
  0x55   :  { %s403_s9 = sshll.u32 %s669_s2, 4  ;;  %s404_s9 = int_to_ptr.vmem [resolvable:$true] %s403_s9 }
  0x56   :  { %p636_p11 = scmp.lt.s32.totalorder %s404_s9, %s404_s9 }
  0x57   :  { %489 = vmatpush3.bf16.msra.mxu0 %v488_v63  ;;  %517 = vmatpush1.bf16.msra.mxu1 %v516_v44 }
  0x58   :  { %523 = vmatprep.subr.bf16.mxu0 %v522_v3  ;;  %519 = vmatprep.subr.bf16.mxu1 %v518_v51 }
  0x5a   :  { %464 = vmatmul.mubr.f32.vlgmr.msra.gmra.mrb[0].mxu0 %v65_v8  ;;  %v241_v8 = vsub.s32 2, %v232_v6 }
  0x5b   :  { %525 = vmatpush1.bf16.msra.mxu0 %v524_v9  ;;  %386 = vmatprep.mubr.f32.mxu0 %v668_v1  ;;  %v203_v1 = vld [vmem:[#allocation8 + $0x130] sm:$0xff]  ;;  %v229_v9 = vld [vmem:[%s769_s4] sm:$0xf]  ;;  %s631_s4 = scalar_lea.vmem %s404_s9, 512 }
  0x5c   :  { %527 = vmatprep.subr.bf16.mxu0 %v526_v10  ;;  %v540_v31 = vpack.c.bf16 %v203_v1, %v199_v28  ;;  %521 = vmatpush1.bf16.msra.mxu1 %v520_v56  ;;  %v237_v10 = vsub.s32 1, %v232_v6  ;;  %v234_v12 = vrot.slane %v229_v9, %v233_v7  ;;  %v242_v13 = vrot.slane %v229_v9, %v241_v8  ;;  %p632_p10 = scmp.ne.s32.totalorder %s404_s9, %s631_s4  ;;  %p637_p12 = scmp.lt.s32.totalorder %s631_s4, %s631_s4 }
  0x5e   :  { %v238_v14 = vrot.slane %v229_v9, %v237_v10  ;;  %p638_p13 = por %p637_p12, %p636_p11 }
  0x5f   :  { %529 = vmatpush1.bf16.msra.mxu0 %v528_v15  ;;  %v246_v15 = vrot.slane %v229_v9, %v245_v11 }
  0x60   :  { %531 = vmatprep.subr.bf16.mxu0 %v530_v0  ;;  %p639_p0 = pnand %p638_p13, %p632_p10 }
  0x63   :  { %533 = vmatpush1.bf16.msra.mxu0 %v532_v20 }
  0x64   :  { %535 = vmatprep.subr.bf16.mxu0 %v534_v21 }
  0x67   :  { %537 = vmatpush1.bf16.msra.mxu0 %v536_v26 }
  0x68   :  { %539 = vmatprep.subr.bf16.mxu0 %v538_v27 }
  0x6b   :  { %541 = vmatpush1.bf16.msra.mxu0 %v540_v31 }
  0x6c   :  { %543 = vmatprep.subr.bf16.mxu0 %v542_v32 }
  0x6f   :  { %545 = vmatpush1.bf16.msra.mxu0 %v544_v35 }
  0x70   :  { %547 = vmatprep.subr.bf16.mxu0 %v546_v43 }
  0x73   :  { %549 = vmatpush1.bf16.msra.mxu0 %v548_v47 }
  0x74   :  { %551 = vmatprep.subr.bf16.mxu0 %v550_v55 }
  0x77   :  { %553 = vmatpush1.bf16.msra.mxu0 %v552_v59 }
 0x12d   :  { %v155_v61 = vpop.f32.mrb[0].mxu0 }
 0x12e   :  { %v156_v62 = vadd.f32 %v413_v60, %v155_v61  ;;  %v465_v63 = vpop.f32.mrb[1].mxu0 }
 0x130   :  { %vm159_vm1 = vcmp.ge.f32.partialorder %v156_v62, 0.0  ;;  %v160_v2 = vmul.f32 0.01, %v156_v62 }
 0x132   :  { %v161_v3 = vsel %vm159_vm1, %v156_v62, %v160_v2 }
 0x133   :  { %v162_v4 = vmul.f32 0.088388346, %v161_v3 }
 0x135   :  { %316 = vmatmul.mubr.f32.vlgmr.msra.gmra.mrb[0].mxu1 %v162_v4  ;;  %387 = vmatmul.mubr.f32.vlgmr.msra.gmra.mrb[2].mxu0 %v162_v4 }
 0x208   :  { %v317_v0 = vpop.f32.mrb[0].mxu1  ;;  %v388_v16 = vpop.f32.mrb[2].mxu0 }
 0x209   :  { %v318_v17 = vadd.f32 %v317_v0, %v234_v12  ;;  %v389_v18 = vadd.f32 %v388_v16, %v242_v13  ;;  %v319_v19 = vpop.f32.mrb[1].mxu1  ;;  %v390_v20 = vpop.f32.mrb[3].mxu0 }
 0x20a   :  { %v320_v21 = vadd.f32 %v319_v19, %v238_v14  ;;  %v391_v22 = vadd.f32 %v390_v20, %v246_v15 }
 0x20b   :  { %393 = vst [vmem:[#allocation9] sm:$0xff] %v318_v17  ;;  %395 = vst [vmem:[#allocation9 + $0x10] sm:$0xff] %v389_v18 }
 0x20c   :  { %394 = vst [vmem:[#allocation9 + $0x8] sm:$0xff] %v320_v21  ;;  %396 = vst [vmem:[#allocation9 + $0x18] sm:$0xff] %v391_v22 }
 0x20d   :  { %642 = shalt.err (!%p639_p0)
}
 0x20e   :  { %s643_s12 = scalar_lea.hbm %s770_s5, 512 }
 0x20f   :  { %p644_p1 = scmp.ne.s32.totalorder %s770_s5, %s643_s12  ;;  %p647_p2 = scmp.lt.u32.totalorder %s643_s12, %s770_s5 }
 0x211   :  { %p649_p3 = pnand %p647_p2, %p644_p1 }
 0x213   :  { %652 = shalt.err (!%p649_p3)
}
 0x214   :  { %406 = dma.vmem_to_hbm [thread:$0]  %s404_s9, 512, %s770_s5, [#allocation5]  }
 0x215   :  { %657 = dma.done.wait [#allocation5], 512  }
 0x216   :  { %658 = vsyncadd [#allocation5], 4294966784 }
 0x217   :  { %410 = vsyncpa [#allocation4], 1 }
 0x218   :  { %411 = vsyncpa [#allocation7], 1 }
 0x219   :  { %412 = vsyncpa [#allocation5], 1 }

</bundles_post_ra>
